<compile_context>
chip_gen: v6e
topology: v6e:2x2x1
jax: 0.10.0
libtpu: 0.0.40
codegen_flags: <defaults>
</compile_context>

<pallas_src>
import math
import numpy as np
import jax
import jax.numpy as jnp
from jax.experimental import pallas as pl
from jax.experimental.pallas import tpu as pltpu

# ----------------------------- config ---------------------------------------
N_EMB    = 192
FF_INNER = int(math.ceil(N_EMB * 2 / 3 * 4))     # 512
B, N     = 2, 8                                  # batch, seq len


# ------------------------------- kernel --------------------------------------
def mlp_kernel(x_ref, w1_ref, w2_ref, o_ref):
    # x_ref : (M, D)     bf16   (M = B*N folded rows)
    # w1_ref: (D, 2*FF)  bf16
    # w2_ref: (FF, D)    bf16
    # o_ref : (M, D)     f32
    a = jnp.dot(x_ref[...], w1_ref[...],
                preferred_element_type=jnp.float32)            # (M, 2*FF) f32 acc
    xp   = a[:, :FF_INNER]                                     # "x" chunk
    gate = a[:, FF_INNER:]                                     # "gate" chunk
    act = xp * (gate * jax.nn.sigmoid(gate))                   # SwiGLU, f32 elementwise
    y = jnp.dot(act.astype(jnp.bfloat16), w2_ref[...],
                preferred_element_type=jnp.float32)            # (M, D) f32 acc
    o_ref[...] = y.astype(o_ref.dtype)
    # TODO(synk): nn.Dropout(config.dropout) is identity at inference; not implemented.


# ------------------------------ wrapper ---------------------------------------
def mlp(x, w1, w2):
    bsz, n, d = x.shape
    m = bsz * n                                   # fold batch x seq -> one M dim
    x2  = x.reshape(m, d).astype(jnp.bfloat16)
    w1b = w1.astype(jnp.bfloat16)
    w2b = w2.astype(jnp.bfloat16)

    out = pl.pallas_call(
        mlp_kernel,
        out_shape=jax.ShapeDtypeStruct((m, d), x.dtype),
        grid=(1,),                                # single invocation (no per-step overhead)
        in_specs=[pl.BlockSpec((m, d),      lambda i: (0, 0)),
                  pl.BlockSpec(w1b.shape,   lambda i: (0, 0)),
                  pl.BlockSpec(w2b.shape,   lambda i: (0, 0))],
        out_specs=pl.BlockSpec((m, d), lambda i: (0, 0)),
        compiler_params=pltpu.CompilerParams(dimension_semantics=("arbitrary",)),
    )(x2, w1b, w2b)
    return out.reshape(bsz, n, d)


# ------------------------------- params ---------------------------------------
def init_params(key):
    k1, k2 = jax.random.split(key, 2)

    def lin(k, fi, fo):   # PyTorch-Linear-style uniform init, stored as (in, out) = W.T
        bnd = 1.0 / math.sqrt(fi)
        return jax.random.uniform(k, (fi, fo), jnp.float32, -bnd, bnd)

    w1 = lin(k1, N_EMB, 2 * FF_INNER)             # proj_1 (no bias)
    w2 = lin(k2, FF_INNER, N_EMB)                 # proj_2 (no bias)
    return w1, w2


# --------------------------- pure-JAX reference --------------------------------
def reference(x, w1, w2):
    PREC = jax.lax.Precision.HIGHEST
    a = jnp.einsum("bnd,df->bnf", x, w1, precision=PREC)
    xp, gate = a[..., :FF_INNER], a[..., FF_INNER:]
    return jnp.einsum("bnf,fd->bnd", xp * jax.nn.silu(gate), w2, precision=PREC)


# --------------------------------- main ----------------------------------------
if __name__ == "__main__":
    key = jax.random.PRNGKey(0)
    kx, kp = jax.random.split(key, 2)
    x = jax.random.normal(kx, (B, N, N_EMB), jnp.float32)
    w1, w2 = init_params(kp)

    out = mlp(x, w1, w2)
    out = jax.block_until_ready(out)

    ref = reference(x, w1, w2)
    # bf16 matmul operands with f32 accumulation vs f32 reference
    np.testing.assert_allclose(np.asarray(out), np.asarray(ref), rtol=2e-2, atol=2e-2)
    print("KERNEL_OK")
</pallas_src>

<mosaic_0001>
module attributes {stable_mosaic.version = 11 : i64} {
  func.func @mlp_kernel(%arg0: i32, %arg1: memref<16x192xbf16, #tpu.memory_space<vmem>>, %arg2: memref<192x1024xbf16, #tpu.memory_space<vmem>>, %arg3: memref<512x192xbf16, #tpu.memory_space<vmem>>, %arg4: memref<16x192xf32, #tpu.memory_space<vmem>>) attributes {dimension_semantics = [#tpu.dimension_semantics<arbitrary>], iteration_bounds = array<i64: 1>, scalar_prefetch = 0 : i64, scratch_operands = 0 : i64, tpu.core_type = #tpu.core_type<tc>, window_params = [{pipeline_mode = #tpu.pipeline_mode<synchronous>, transform_indices = @transform_0, window_bounds = array<i64: 16, 192>}, {pipeline_mode = #tpu.pipeline_mode<synchronous>, transform_indices = @transform_1, window_bounds = array<i64: 192, 1024>}, {pipeline_mode = #tpu.pipeline_mode<synchronous>, transform_indices = @transform_2, window_bounds = array<i64: 512, 192>}, {pipeline_mode = #tpu.pipeline_mode<synchronous>, transform_indices = @transform_3, window_bounds = array<i64: 16, 192>}]} {
    %c0 = arith.constant 0 : index
    %c0_0 = arith.constant 0 : index
    %0 = vector.load %arg1[%c0, %c0_0] : memref<16x192xbf16, #tpu.memory_space<vmem>>, vector<16x192xbf16>
    %c0_1 = arith.constant 0 : index
    %c0_2 = arith.constant 0 : index
    %1 = vector.load %arg2[%c0_1, %c0_2] : memref<192x1024xbf16, #tpu.memory_space<vmem>>, vector<192x1024xbf16>
    %cst = arith.constant dense<0.000000e+00> : vector<16x1024xf32>
    %2 = tpu.matmul %0, %1, %cst {dimension_numbers = #tpu.dot_dimension_numbers<[1], [0], [0], [1], [0, 0, 1, 1], [], []>} : vector<16x192xbf16>, vector<192x1024xbf16>, vector<16x1024xf32> -> vector<16x1024xf32>
    %3 = vector.extract_strided_slice %2 {offsets = [0, 0], sizes = [16, 512], strides = [1, 1]} : vector<16x1024xf32> to vector<16x512xf32>
    %4 = vector.extract_strided_slice %2 {offsets = [0, 512], sizes = [16, 512], strides = [1, 1]} : vector<16x1024xf32> to vector<16x512xf32>
    %5 = arith.negf %4 : vector<16x512xf32>
    %6 = math.exp %5 : vector<16x512xf32>
    %cst_3 = arith.constant 1.000000e+00 : f32
    %7 = vector.broadcast %cst_3 : f32 to vector<16x512xf32>
    %8 = arith.addf %7, %6 : vector<16x512xf32>
    %9 = arith.divf %7, %8 : vector<16x512xf32>
    %10 = arith.mulf %4, %9 : vector<16x512xf32>
    %11 = arith.mulf %3, %10 : vector<16x512xf32>
    %12 = arith.truncf %11 : vector<16x512xf32> to vector<16x512xbf16>
    %c0_4 = arith.constant 0 : index
    %c0_5 = arith.constant 0 : index
    %13 = vector.load %arg3[%c0_4, %c0_5] : memref<512x192xbf16, #tpu.memory_space<vmem>>, vector<512x192xbf16>
    %cst_6 = arith.constant dense<0.000000e+00> : vector<16x192xf32>
    %14 = tpu.matmul %12, %13, %cst_6 {dimension_numbers = #tpu.dot_dimension_numbers<[1], [0], [0], [1], [0, 0, 1, 1], [], []>} : vector<16x512xbf16>, vector<512x192xbf16>, vector<16x192xf32> -> vector<16x192xf32>
    %c0_7 = arith.constant 0 : index
    %c0_8 = arith.constant 0 : index
    %15 = vector.load %arg4[%c0_7, %c0_8] : memref<16x192xf32, #tpu.memory_space<vmem>>, vector<16x192xf32>
    tpu.vector_store %arg4[%c0_7, %c0_8], %14 {strides = array<i32>} : memref<16x192xf32, #tpu.memory_space<vmem>>, vector<16x192xf32>,
    return
  }
  func.func @transform_0(%arg0: i32) -> (i32, i32) {
    %c0_i32 = arith.constant 0 : i32
    %c0_i32_0 = arith.constant 0 : i32
    %c0_i32_1 = arith.constant 0 : i32
    return %c0_i32, %c0_i32_0 : i32, i32
  }
  func.func @transform_1(%arg0: i32) -> (i32, i32) {
    %c0_i32 = arith.constant 0 : i32
    %c0_i32_0 = arith.constant 0 : i32
    %c0_i32_1 = arith.constant 0 : i32
    return %c0_i32, %c0_i32_0 : i32, i32
  }
  func.func @transform_2(%arg0: i32) -> (i32, i32) {
    %c0_i32 = arith.constant 0 : i32
    %c0_i32_0 = arith.constant 0 : i32
    %c0_i32_1 = arith.constant 0 : i32
    return %c0_i32, %c0_i32_0 : i32, i32
  }
  func.func @transform_3(%arg0: i32) -> (i32, i32) {
    %c0_i32 = arith.constant 0 : i32
    %c0_i32_0 = arith.constant 0 : i32
    %c0_i32_1 = arith.constant 0 : i32
    return %c0_i32, %c0_i32_0 : i32, i32
  }
}

</mosaic_0001>

<bundles_post_ra>
// kernel: tpu_custom_call.1
= control target key start
LH: loop header
LB: loop body
LE: loop exit
PB: predicated region body
PF: predicated region fallthrough
CT: control target
= control target key end

     0   :  { %vm603_vm0 = vcmask 523264   ;;  %s2221_s0 = inlined_call_operand.vmem [shape: bf16[16,192], index: 0, kind: input, shape index: {}]   ;;  %s2222_s1 = inlined_call_operand.vmem [shape: bf16[192,1024], index: 1, kind: input, shape index: {}]   ;;  %s2223_s2 = inlined_call_operand.vmem [shape: bf16[512,192], index: 2, kind: input, shape index: {}]   ;;  %s2224_s3 = inlined_call_operand.hbm [shape: f32[16,192], index: 3, kind: output, shape index: {}]  }
   0x1   :  { %v74_v0 = vld [vmem:[%s2222_s1 + $0x1c0] sm:$0xff]  ;;  %v75_v2 = vld [vmem:[%s2222_s1 + $0x1c8] sm:$0xff] }
   0x2   :  { %v78_v1 = vld [vmem:[%s2222_s1 + $0x1e0] sm:$0xff]  ;;  %v79_v4 = vld [vmem:[%s2222_s1 + $0x1e8] sm:$0xff] }
   0x3   :  { %v1396_v3 = vcombine.high %v74_v0, %v78_v1  ;;  %v1395_v5 = vcombine.low %v74_v0, %v78_v1  ;;  %v66_v6 = vld [vmem:[%s2222_s1 + $0x180] sm:$0xff]  ;;  %v1398_v8 = vcombine.high %v75_v2, %v79_v4  ;;  %v1397_v9 = vcombine.low %v75_v2, %v79_v4  ;;  %v67_v11 = vld [vmem:[%s2222_s1 + $0x188] sm:$0xff] }
   0x4   :  { %v70_v7 = vld [vmem:[%s2222_s1 + $0x1a0] sm:$0xff]  ;;  %v71_v12 = vld [vmem:[%s2222_s1 + $0x1a8] sm:$0xff] }
   0x5   :  { %v1388_v10 = vcombine.high %v66_v6, %v70_v7  ;;  %v58_v13 = vld [vmem:[%s2222_s1 + $0x140] sm:$0xff]  ;;  %607 = vmatprep.subr.bf16.mxu0 %v1396_v3  ;;  %v1390_v14 = vcombine.high %v67_v11, %v71_v12  ;;  %v59_v16 = vld [vmem:[%s2222_s1 + $0x148] sm:$0xff]  ;;  %650 = vmatprep.subr.bf16.mxu1 %v1398_v8  ;;  %v1387_v18 = vcombine.low %v66_v6, %v70_v7 }
   0x6   :  { %v62_v15 = vld [vmem:[%s2222_s1 + $0x160] sm:$0xff]  ;;  %v63_v17 = vld [vmem:[%s2222_s1 + $0x168] sm:$0xff]  ;;  %608 = vmatpush1.bf16.msra.mxu0 %v1395_v5  ;;  %651 = vmatpush1.bf16.msra.mxu1 %v1397_v9  ;;  %v1389_v19 = vcombine.low %v67_v11, %v71_v12 }
   0x7   :  { %609 = vmatprep.subr.bf16.mxu0 %v1388_v10  ;;  %v1380_v20 = vcombine.high %v58_v13, %v62_v15  ;;  %652 = vmatprep.subr.bf16.mxu1 %v1390_v14  ;;  %v1382_v21 = vcombine.high %v59_v16, %v63_v17  ;;  %v50_v22 = vld [vmem:[%s2222_s1 + $0x100] sm:$0xff]  ;;  %v51_v24 = vld [vmem:[%s2222_s1 + $0x108] sm:$0xff]  ;;  %v1379_v26 = vcombine.low %v58_v13, %v62_v15 }
   0x8   :  { %v54_v23 = vld [vmem:[%s2222_s1 + $0x120] sm:$0xff]  ;;  %v55_v25 = vld [vmem:[%s2222_s1 + $0x128] sm:$0xff]  ;;  %v1381_v27 = vcombine.low %v59_v16, %v63_v17 }
   0x9   :  { %v1372_v28 = vcombine.high %v50_v22, %v54_v23  ;;  %v1374_v29 = vcombine.high %v51_v24, %v55_v25  ;;  %v42_v30 = vld [vmem:[%s2222_s1 + $0xc0] sm:$0xff]  ;;  %v43_v32 = vld [vmem:[%s2222_s1 + $0xc8] sm:$0xff]  ;;  %v1371_v34 = vcombine.low %v50_v22, %v54_v23  ;;  %v1373_v35 = vcombine.low %v51_v24, %v55_v25 }
   0xa   :  { %610 = vmatpush1.bf16.msra.mxu0 %v1387_v18  ;;  %653 = vmatpush1.bf16.msra.mxu1 %v1389_v19  ;;  %v46_v31 = vld [vmem:[%s2222_s1 + $0xe0] sm:$0xff]  ;;  %v47_v33 = vld [vmem:[%s2222_s1 + $0xe8] sm:$0xff] }
   0xb   :  { %611 = vmatprep.subr.bf16.mxu0 %v1380_v20  ;;  %654 = vmatprep.subr.bf16.mxu1 %v1382_v21  ;;  %v1364_v36 = vcombine.high %v42_v30, %v46_v31  ;;  %v1366_v37 = vcombine.high %v43_v32, %v47_v33  ;;  %v34_v38 = vld [vmem:[%s2222_s1 + $0x80] sm:$0xff]  ;;  %v35_v40 = vld [vmem:[%s2222_s1 + $0x88] sm:$0xff]  ;;  %v1363_v42 = vcombine.low %v42_v30, %v46_v31 }
   0xc   :  { %v38_v39 = vld [vmem:[%s2222_s1 + $0xa0] sm:$0xff]  ;;  %v39_v41 = vld [vmem:[%s2222_s1 + $0xa8] sm:$0xff]  ;;  %v1365_v44 = vcombine.low %v43_v32, %v47_v33  ;;  %v77_v32 = vld [vmem:[%s2222_s1 + $0x1d8] sm:$0xff] }
   0xd   :  { %v1765_v43 = vld [vmem:[%s2221_s0 + $0x4] ss:$8 sps:$4 sm:$0xff]   ;;  %v1356_v45 = vcombine.high %v34_v38, %v38_v39  ;;  %v1358_v46 = vcombine.high %v35_v40, %v39_v41  ;;  %v1355_v51 = vcombine.low %v34_v38, %v38_v39  ;;  %v1357_v52 = vcombine.low %v35_v40, %v39_v41  ;;  %v81_v33 = vld [vmem:[%s2222_s1 + $0x1f8] sm:$0xff]  ;;  %v1864_v39 = vld [vmem:[%s2221_s0] ss:$8 sps:$4 sm:$0xff]  }
   0xe   :  { %612 = vmatpush1.bf16.msra.mxu0 %v1379_v26  ;;  %655 = vmatpush1.bf16.msra.mxu1 %v1381_v27  ;;  %v26_v47 = vld [vmem:[%s2222_s1 + $0x40] sm:$0xff]  ;;  %v27_v49 = vld [vmem:[%s2222_s1 + $0x48] sm:$0xff]  ;;  %v69_v41 = vld [vmem:[%s2222_s1 + $0x198] sm:$0xff] }
   0xf   :  { %613 = vmatprep.subr.bf16.mxu0 %v1372_v28  ;;  %656 = vmatprep.subr.bf16.mxu1 %v1374_v29  ;;  %v30_v48 = vld [vmem:[%s2222_s1 + $0x60] sm:$0xff]  ;;  %v31_v50 = vld [vmem:[%s2222_s1 + $0x68] sm:$0xff]  ;;  %v76_v28 = vld [vmem:[%s2222_s1 + $0x1d0] sm:$0xff] }
  0x10   :  { %1435 = vmatprep.mubr.msk.bf16.mxu0 %vm603_vm0, %v1765_v43  ;;  %1436 = vmatprep.mubr.msk.bf16.mxu1 %vm603_vm0, %v1765_v43  ;;  %v1348_v53 = vcombine.high %v26_v47, %v30_v48  ;;  %v1350_v54 = vcombine.high %v27_v49, %v31_v50  ;;  %v18_v55 = vld [vmem:[%s2222_s1] sm:$0xff]  ;;  %v19_v57 = vld [vmem:[%s2222_s1 + $0x8] sm:$0xff]  ;;  %v1347_v59 = vcombine.low %v26_v47, %v30_v48  ;;  %v80_v29 = vld [vmem:[%s2222_s1 + $0x1f0] sm:$0xff] }
  0x11   :  { %v22_v56 = vld [vmem:[%s2222_s1 + $0x20] sm:$0xff]  ;;  %v23_v58 = vld [vmem:[%s2222_s1 + $0x28] sm:$0xff]  ;;  %v1349_v60 = vcombine.low %v27_v49, %v31_v50  ;;  %v1400_v40 = vcombine.high %v76_v28, %v80_v29  ;;  %v64_v47 = vld [vmem:[%s2222_s1 + $0x170] sm:$0xff]  ;;  %v1401_v48 = vcombine.low %v77_v32, %v81_v33 }
  0x12   :  { %614 = vmatpush1.bf16.msra.mxu0 %v1371_v34  ;;  %657 = vmatpush1.bf16.msra.mxu1 %v1373_v35  ;;  %v1340_v61 = vcombine.high %v18_v55, %v22_v56  ;;  %v1342_v62 = vcombine.high %v19_v57, %v23_v58  ;;  %v106_v63 = vld [vmem:[%s2222_s1 + $0x2c0] sm:$0xff]  ;;  %v107_v1 = vld [vmem:[%s2222_s1 + $0x2c8] sm:$0xff]  ;;  %v1339_v3 = vcombine.low %v18_v55, %v22_v56  ;;  %v61_v50 = vld [vmem:[%s2222_s1 + $0x158] sm:$0xff] }
  0x13   :  { %615 = vmatprep.subr.bf16.mxu0 %v1364_v36  ;;  %658 = vmatprep.subr.bf16.mxu1 %v1366_v37  ;;  %v110_v0 = vld [vmem:[%s2222_s1 + $0x2e0] sm:$0xff]  ;;  %v111_v2 = vld [vmem:[%s2222_s1 + $0x2e8] sm:$0xff]  ;;  %v1341_v4 = vcombine.low %v19_v57, %v23_v58  ;;  %v68_v36 = vld [vmem:[%s2222_s1 + $0x190] sm:$0xff] }
  0x14   :  { %v1428_v5 = vcombine.high %v106_v63, %v110_v0  ;;  %v1430_v6 = vcombine.high %v107_v1, %v111_v2  ;;  %v98_v7 = vld [vmem:[%s2222_s1 + $0x280] sm:$0xff]  ;;  %v99_v9 = vld [vmem:[%s2222_s1 + $0x288] sm:$0xff]  ;;  %v1427_v11 = vcombine.low %v106_v63, %v110_v0  ;;  %v1429_v14 = vcombine.low %v107_v1, %v111_v2  ;;  %v72_v37 = vld [vmem:[%s2222_s1 + $0x1b0] sm:$0xff] }
  0x15   :  { %v102_v8 = vld [vmem:[%s2222_s1 + $0x2a0] sm:$0xff]  ;;  %v103_v10 = vld [vmem:[%s2222_s1 + $0x2a8] sm:$0xff]  ;;  %v1392_v49 = vcombine.high %v68_v36, %v72_v37  ;;  %v56_v55 = vld [vmem:[%s2222_s1 + $0x130] sm:$0xff] }
  0x16   :  { %616 = vmatpush1.bf16.msra.mxu0 %v1363_v42  ;;  %659 = vmatpush1.bf16.msra.mxu1 %v1365_v44  ;;  %v90_v12 = vld [vmem:[%s2222_s1 + $0x240] sm:$0xff]  ;;  %v1420_v15 = vcombine.high %v98_v7, %v102_v8  ;;  %v91_v16 = vld [vmem:[%s2222_s1 + $0x248] sm:$0xff]  ;;  %v1422_v18 = vcombine.high %v99_v9, %v103_v10  ;;  %v1419_v19 = vcombine.low %v98_v7, %v102_v8  ;;  %v73_v42 = vld [vmem:[%s2222_s1 + $0x1b8] sm:$0xff] }
  0x17   :  { %617 = vmatprep.subr.bf16.mxu0 %v1356_v45  ;;  %660 = vmatprep.subr.bf16.mxu1 %v1358_v46  ;;  %v94_v13 = vld [vmem:[%s2222_s1 + $0x260] sm:$0xff]  ;;  %v95_v17 = vld [vmem:[%s2222_s1 + $0x268] sm:$0xff]  ;;  %v1421_v22 = vcombine.low %v99_v9, %v103_v10  ;;  %v1402_v44 = vcombine.high %v77_v32, %v81_v33  ;;  %v1399_v45 = vcombine.low %v76_v28, %v80_v29  ;;  %v60_v46 = vld [vmem:[%s2222_s1 + $0x150] sm:$0xff] }
  0x18   :  { %v82_v20 = vld [vmem:[%s2222_s1 + $0x200] sm:$0xff]  ;;  %v1412_v23 = vcombine.high %v90_v12, %v94_v13  ;;  %v83_v24 = vld [vmem:[%s2222_s1 + $0x208] sm:$0xff]  ;;  %v1414_v26 = vcombine.high %v91_v16, %v95_v17  ;;  %v1411_v27 = vcombine.low %v90_v12, %v94_v13  ;;  %v1413_v30 = vcombine.low %v91_v16, %v95_v17 }
  0x19   :  { %v86_v21 = vld [vmem:[%s2222_s1 + $0x220] sm:$0xff]  ;;  %v87_v25 = vld [vmem:[%s2222_s1 + $0x228] sm:$0xff]  ;;  %v1393_v56 = vcombine.low %v69_v41, %v73_v42  ;;  %v1384_v57 = vcombine.high %v60_v46, %v64_v47 }
  0x1a   :  { %618 = vmatpush1.bf16.msra.mxu0 %v1355_v51  ;;  %661 = vmatpush1.bf16.msra.mxu1 %v1357_v52  ;;  %v1404_v31 = vcombine.high %v82_v20, %v86_v21  ;;  %v1406_v34 = vcombine.high %v83_v24, %v87_v25  ;;  %v1403_v35 = vcombine.low %v82_v20, %v86_v21  ;;  %v65_v51 = vld [vmem:[%s2222_s1 + $0x178] sm:$0xff] }
  0x1b   :  { %619 = vmatprep.subr.bf16.mxu0 %v1348_v53  ;;  %662 = vmatprep.subr.bf16.mxu1 %v1350_v54  ;;  %v1405_v38 = vcombine.low %v83_v24, %v87_v25  ;;  %v1394_v52 = vcombine.high %v69_v41, %v73_v42  ;;  %v1391_v53 = vcombine.low %v68_v36, %v72_v37  ;;  %v52_v54 = vld [vmem:[%s2222_s1 + $0x110] sm:$0xff] }
  0x1c   :  { %v1386_v58 = vcombine.high %v61_v50, %v65_v51 }
  0x1e   :  { %620 = vmatpush1.bf16.msra.mxu0 %v1347_v59  ;;  %663 = vmatpush1.bf16.msra.mxu1 %v1349_v60 }
  0x1f   :  { %621 = vmatprep.subr.bf16.mxu0 %v1340_v61  ;;  %664 = vmatprep.subr.bf16.mxu1 %v1342_v62 }
  0x22   :  { %622 = vmatpush1.bf16.msra.mxu0 %v1339_v3  ;;  %665 = vmatpush1.bf16.msra.mxu1 %v1341_v4 }
  0x23   :  { %631 = vmatprep.subr.bf16.mxu0 %v1428_v5  ;;  %674 = vmatprep.subr.bf16.mxu1 %v1430_v6 }
  0x26   :  { %632 = vmatpush2.bf16.msra.mxu0 %v1427_v11  ;;  %675 = vmatpush2.bf16.msra.mxu1 %v1429_v14 }
  0x27   :  { %633 = vmatprep.subr.bf16.mxu0 %v1420_v15  ;;  %676 = vmatprep.subr.bf16.mxu1 %v1422_v18 }
  0x2a   :  { %634 = vmatpush2.bf16.msra.mxu0 %v1419_v19  ;;  %677 = vmatpush2.bf16.msra.mxu1 %v1421_v22 }
  0x2b   :  { %635 = vmatprep.subr.bf16.mxu0 %v1412_v23  ;;  %678 = vmatprep.subr.bf16.mxu1 %v1414_v26 }
  0x2e   :  { %636 = vmatpush2.bf16.msra.mxu0 %v1411_v27  ;;  %679 = vmatpush2.bf16.msra.mxu1 %v1413_v30 }
  0x2f   :  { %637 = vmatprep.subr.bf16.mxu0 %v1404_v31  ;;  %680 = vmatprep.subr.bf16.mxu1 %v1406_v34 }
  0x32   :  { %638 = vmatpush2.bf16.msra.mxu0 %v1403_v35  ;;  %681 = vmatpush2.bf16.msra.mxu1 %v1405_v38 }
  0x33   :  { %693 = vmatprep.subr.bf16.mxu0 %v1400_v40  ;;  %736 = vmatprep.subr.bf16.mxu1 %v1402_v44 }
  0x35   :  { %640 = vmatmul.mubr.bf16.vlgmr.msra.gmra.mxu0 %v1864_v39  ;;  %683 = vmatmul.mubr.bf16.vlgmr.msra.gmra.mxu1 %v1864_v39 }
  0x36   :  { %694 = vmatpush1.bf16.msra.mxu0 %v1399_v45  ;;  %737 = vmatpush1.bf16.msra.mxu1 %v1401_v48 }
  0x37   :  { %695 = vmatprep.subr.bf16.mxu0 %v1392_v49  ;;  %738 = vmatprep.subr.bf16.mxu1 %v1394_v52 }
  0x38   :  { %1437 = vmatprep.mubr.msk.bf16.mxu0 %vm603_vm0, %v1765_v43 }
  0x39   :  { %8 = vsyncpa [#allocation3], 0  ;;  %v53_v59 = vld [vmem:[%s2222_s1 + $0x118] sm:$0xff]  ;;  %1438 = vmatprep.mubr.msk.bf16.mxu1 %vm603_vm0, %v1765_v43  ;;  %v1383_v61 = vcombine.low %v60_v46, %v64_v47  ;;  %v1385_v62 = vcombine.low %v61_v50, %v65_v51  ;;  %v1376_v63 = vcombine.high %v52_v54, %v56_v55  ;;  %v44_v1 = vld [vmem:[%s2222_s1 + $0xd0] sm:$0xff]  ;;  %v1375_v4 = vcombine.low %v52_v54, %v56_v55 }
  0x3a   :  { %v57_v60 = vld [vmem:[%s2222_s1 + $0x138] sm:$0xff]  ;;  %696 = vmatpush1.bf16.msra.mxu0 %v1391_v53  ;;  %739 = vmatpush1.bf16.msra.mxu1 %v1393_v56  ;;  %v48_v2 = vld [vmem:[%s2222_s1 + $0xf0] sm:$0xff] }
  0x3b   :  { %697 = vmatprep.subr.bf16.mxu0 %v1384_v57  ;;  %740 = vmatprep.subr.bf16.mxu1 %v1386_v58  ;;  %v1378_v0 = vcombine.high %v53_v59, %v57_v60  ;;  %v45_v43 = vld [vmem:[%s2222_s1 + $0xd8] sm:$0xff]  ;;  %v1377_v5 = vcombine.low %v53_v59, %v57_v60  ;;  %v1368_v6 = vcombine.high %v44_v1, %v48_v2  ;;  %v36_v8 = vld [vmem:[%s2222_s1 + $0x90] sm:$0xff] }
  0x3c   :  { %v49_v3 = vld [vmem:[%s2222_s1 + $0xf8] sm:$0xff]  ;;  %v40_v9 = vld [vmem:[%s2222_s1 + $0xb0] sm:$0xff]  ;;  %v1367_v12 = vcombine.low %v44_v1, %v48_v2 }
  0x3d   :  { %v1370_v7 = vcombine.high %v45_v43, %v49_v3  ;;  %v37_v10 = vld [vmem:[%s2222_s1 + $0x98] sm:$0xff]  ;;  %v1369_v13 = vcombine.low %v45_v43, %v49_v3  ;;  %v1360_v14 = vcombine.high %v36_v8, %v40_v9  ;;  %v28_v16 = vld [vmem:[%s2222_s1 + $0x50] sm:$0xff]  ;;  %v1359_v20 = vcombine.low %v36_v8, %v40_v9  ;;  %v1523_v8 = vld [vmem:[%s2223_s2 + $0x60] ss:$8 sps:$4 sm:$0xff]  }
  0x3e   :  { %698 = vmatpush1.bf16.msra.mxu0 %v1383_v61  ;;  %741 = vmatpush1.bf16.msra.mxu1 %v1385_v62  ;;  %v41_v11 = vld [vmem:[%s2222_s1 + $0xb8] sm:$0xff]  ;;  %v32_v17 = vld [vmem:[%s2222_s1 + $0x70] sm:$0xff]  ;;  %v1526_v9 = vld [vmem:[%s2223_s2 + $0x160] ss:$8 sps:$4 sm:$0xff]  }
  0x3f   :  { %699 = vmatprep.subr.bf16.mxu0 %v1376_v63  ;;  %742 = vmatprep.subr.bf16.mxu1 %v1378_v0  ;;  %v1362_v15 = vcombine.high %v37_v10, %v41_v11  ;;  %v29_v18 = vld [vmem:[%s2222_s1 + $0x58] sm:$0xff]  ;;  %v1361_v21 = vcombine.low %v37_v10, %v41_v11  ;;  %v1352_v22 = vcombine.high %v28_v16, %v32_v17  ;;  %v20_v24 = vld [vmem:[%s2222_s1 + $0x10] sm:$0xff] }
  0x40   :  { %v33_v19 = vld [vmem:[%s2222_s1 + $0x78] sm:$0xff]  ;;  %v24_v25 = vld [vmem:[%s2222_s1 + $0x30] sm:$0xff]  ;;  %v1351_v28 = vcombine.low %v28_v16, %v32_v17  ;;  %v1535_v16 = vld [vmem:[%s2223_s2 + $0x40] ss:$8 sps:$4 sm:$0xff]  }
  0x41   :  { %v1354_v23 = vcombine.high %v29_v18, %v33_v19  ;;  %v21_v26 = vld [vmem:[%s2222_s1 + $0x18] sm:$0xff]  ;;  %v1353_v29 = vcombine.low %v29_v18, %v33_v19  ;;  %v1344_v30 = vcombine.high %v20_v24, %v24_v25  ;;  %v108_v32 = vld [vmem:[%s2222_s1 + $0x2d0] sm:$0xff]  ;;  %v1343_v36 = vcombine.low %v20_v24, %v24_v25  ;;  %v1538_v17 = vld [vmem:[%s2223_s2 + $0x140] ss:$8 sps:$4 sm:$0xff]  }
  0x42   :  { %700 = vmatpush1.bf16.msra.mxu0 %v1375_v4  ;;  %743 = vmatpush1.bf16.msra.mxu1 %v1377_v5  ;;  %v25_v27 = vld [vmem:[%s2222_s1 + $0x38] sm:$0xff]  ;;  %v112_v33 = vld [vmem:[%s2222_s1 + $0x2f0] sm:$0xff]  ;;  %v1547_v24 = vld [vmem:[%s2223_s2 + $0x20] ss:$8 sps:$4 sm:$0xff]  }
  0x43   :  { %701 = vmatprep.subr.bf16.mxu0 %v1368_v6  ;;  %744 = vmatprep.subr.bf16.mxu1 %v1370_v7  ;;  %v1346_v31 = vcombine.high %v21_v26, %v25_v27  ;;  %v109_v34 = vld [vmem:[%s2222_s1 + $0x2d8] sm:$0xff]  ;;  %v1345_v37 = vcombine.low %v21_v26, %v25_v27  ;;  %v1432_v38 = vcombine.high %v108_v32, %v112_v33  ;;  %v100_v41 = vld [vmem:[%s2222_s1 + $0x290] sm:$0xff]  ;;  %v1528_v7 = vld [vmem:[%s2223_s2 + $0x164] ss:$8 sps:$4 sm:$0xff]  }
  0x44   :  { %v113_v35 = vld [vmem:[%s2222_s1 + $0x2f8] sm:$0xff]  ;;  %v104_v42 = vld [vmem:[%s2222_s1 + $0x2b0] sm:$0xff]  ;;  %v1431_v46 = vcombine.low %v108_v32, %v112_v33  ;;  %v1550_v25 = vld [vmem:[%s2223_s2 + $0x120] ss:$8 sps:$4 sm:$0xff]  }
  0x45   :  { %v1434_v40 = vcombine.high %v109_v34, %v113_v35  ;;  %v101_v44 = vld [vmem:[%s2222_s1 + $0x298] sm:$0xff]  ;;  %v1433_v47 = vcombine.low %v109_v34, %v113_v35  ;;  %v1424_v48 = vcombine.high %v100_v41, %v104_v42  ;;  %v92_v50 = vld [vmem:[%s2222_s1 + $0x250] sm:$0xff]  ;;  %v1423_v54 = vcombine.low %v100_v41, %v104_v42  ;;  %v1559_v32 = vld [vmem:[%s2223_s2] ss:$8 sps:$4 sm:$0xff]  }
  0x46   :  { %702 = vmatpush1.bf16.msra.mxu0 %v1367_v12  ;;  %745 = vmatpush1.bf16.msra.mxu1 %v1369_v13  ;;  %v105_v45 = vld [vmem:[%s2222_s1 + $0x2b8] sm:$0xff]  ;;  %v96_v51 = vld [vmem:[%s2222_s1 + $0x270] sm:$0xff]  ;;  %v1562_v33 = vld [vmem:[%s2223_s2 + $0x100] ss:$8 sps:$4 sm:$0xff]  }
  0x47   :  { %703 = vmatprep.subr.bf16.mxu0 %v1360_v14  ;;  %746 = vmatprep.subr.bf16.mxu1 %v1362_v15  ;;  %v1426_v49 = vcombine.high %v101_v44, %v105_v45  ;;  %v93_v52 = vld [vmem:[%s2222_s1 + $0x258] sm:$0xff]  ;;  %v1425_v55 = vcombine.low %v101_v44, %v105_v45  ;;  %v1416_v56 = vcombine.high %v92_v50, %v96_v51  ;;  %v84_v58 = vld [vmem:[%s2222_s1 + $0x210] sm:$0xff]  ;;  %v1537_v14 = vld [vmem:[%s2223_s2 + $0x44] ss:$8 sps:$4 sm:$0xff]  }
  0x48   :  { %v97_v53 = vld [vmem:[%s2222_s1 + $0x278] sm:$0xff]  ;;  %v88_v59 = vld [vmem:[%s2222_s1 + $0x230] sm:$0xff]  ;;  %v1415_v62 = vcombine.low %v92_v50, %v96_v51  ;;  %v1540_v15 = vld [vmem:[%s2223_s2 + $0x144] ss:$8 sps:$4 sm:$0xff]  }
  0x49   :  { %v1418_v57 = vcombine.high %v93_v52, %v97_v53  ;;  %v85_v60 = vld [vmem:[%s2222_s1 + $0x218] sm:$0xff]  ;;  %v1417_v63 = vcombine.low %v93_v52, %v97_v53  ;;  %v1408_v0 = vcombine.high %v84_v58, %v88_v59  ;;  %v1407_v2 = vcombine.low %v84_v58, %v88_v59  ;;  %v1571_v41 = vld [vmem:[%s2223_s2 + $0xe0] ss:$8 sps:$4 sm:$0xff]  }
  0x4a   :  { %704 = vmatpush1.bf16.msra.mxu0 %v1359_v20  ;;  %747 = vmatpush1.bf16.msra.mxu1 %v1361_v21  ;;  %v89_v61 = vld [vmem:[%s2222_s1 + $0x238] sm:$0xff]  ;;  %v1574_v42 = vld [vmem:[%s2223_s2 + $0x1e0] ss:$8 sps:$4 sm:$0xff]  }
  0x4b   :  { %705 = vmatprep.subr.bf16.mxu0 %v1352_v22  ;;  %748 = vmatprep.subr.bf16.mxu1 %v1354_v23  ;;  %v1410_v1 = vcombine.high %v85_v60, %v89_v61  ;;  %v1409_v43 = vcombine.low %v85_v60, %v89_v61  ;;  %v1517_v3 = vld [vmem:[%s2223_s2 + $0x70] ss:$8 sps:$4 sm:$0xff]   ;;  %v1519_v4 = vld [vmem:[%s2223_s2 + $0x74] ss:$8 sps:$4 sm:$0xff]   ;;  %v1549_v22 = vld [vmem:[%s2223_s2 + $0x24] ss:$8 sps:$4 sm:$0xff]  }
  0x4c   :  { %v1520_v5 = vld [vmem:[%s2223_s2 + $0x170] ss:$8 sps:$4 sm:$0xff]   ;;  %v1522_v6 = vld [vmem:[%s2223_s2 + $0x174] ss:$8 sps:$4 sm:$0xff]   ;;  %v1552_v23 = vld [vmem:[%s2223_s2 + $0x124] ss:$8 sps:$4 sm:$0xff]  }
  0x4d   :  { %v1531_v10 = vld [vmem:[%s2223_s2 + $0x54] ss:$8 sps:$4 sm:$0xff]   ;;  %v1529_v12 = vld [vmem:[%s2223_s2 + $0x50] ss:$8 sps:$4 sm:$0xff]   ;;  %v1583_v50 = vld [vmem:[%s2223_s2 + $0xc0] ss:$8 sps:$4 sm:$0xff]  }
  0x4e   :  { %706 = vmatpush1.bf16.msra.mxu0 %v1351_v28  ;;  %749 = vmatpush1.bf16.msra.mxu1 %v1353_v29  ;;  %v1534_v11 = vld [vmem:[%s2223_s2 + $0x154] ss:$8 sps:$4 sm:$0xff]   ;;  %v1532_v13 = vld [vmem:[%s2223_s2 + $0x150] ss:$8 sps:$4 sm:$0xff]   ;;  %v1586_v51 = vld [vmem:[%s2223_s2 + $0x1c0] ss:$8 sps:$4 sm:$0xff]  }
  0x4f   :  { %707 = vmatprep.subr.bf16.mxu0 %v1344_v30  ;;  %750 = vmatprep.subr.bf16.mxu1 %v1346_v31  ;;  %v1543_v18 = vld [vmem:[%s2223_s2 + $0x34] ss:$8 sps:$4 sm:$0xff]   ;;  %v1541_v20 = vld [vmem:[%s2223_s2 + $0x30] ss:$8 sps:$4 sm:$0xff]   ;;  %v1561_v30 = vld [vmem:[%s2223_s2 + $0x4] ss:$8 sps:$4 sm:$0xff]  }
  0x50   :  { %v1546_v19 = vld [vmem:[%s2223_s2 + $0x134] ss:$8 sps:$4 sm:$0xff]   ;;  %v1544_v21 = vld [vmem:[%s2223_s2 + $0x130] ss:$8 sps:$4 sm:$0xff]   ;;  %v1564_v31 = vld [vmem:[%s2223_s2 + $0x104] ss:$8 sps:$4 sm:$0xff]  }
  0x51   :  { %v1555_v26 = vld [vmem:[%s2223_s2 + $0x14] ss:$8 sps:$4 sm:$0xff]   ;;  %v1553_v28 = vld [vmem:[%s2223_s2 + $0x10] ss:$8 sps:$4 sm:$0xff]   ;;  %v1595_v58 = vld [vmem:[%s2223_s2 + $0xa0] ss:$8 sps:$4 sm:$0xff]  }
  0x52   :  { %708 = vmatpush1.bf16.msra.mxu0 %v1343_v36  ;;  %751 = vmatpush1.bf16.msra.mxu1 %v1345_v37  ;;  %v1558_v27 = vld [vmem:[%s2223_s2 + $0x114] ss:$8 sps:$4 sm:$0xff]   ;;  %v1556_v29 = vld [vmem:[%s2223_s2 + $0x110] ss:$8 sps:$4 sm:$0xff]   ;;  %v1598_v59 = vld [vmem:[%s2223_s2 + $0x1a0] ss:$8 sps:$4 sm:$0xff]  }
  0x53   :  { %717 = vmatprep.subr.bf16.mxu0 %v1432_v38  ;;  %760 = vmatprep.subr.bf16.mxu1 %v1434_v40  ;;  %v1567_v34 = vld [vmem:[%s2223_s2 + $0xf4] ss:$8 sps:$4 sm:$0xff]   ;;  %v1565_v36 = vld [vmem:[%s2223_s2 + $0xf0] ss:$8 sps:$4 sm:$0xff]   ;;  %v1573_v38 = vld [vmem:[%s2223_s2 + $0xe4] ss:$8 sps:$4 sm:$0xff]  }
  0x54   :  { %v1570_v35 = vld [vmem:[%s2223_s2 + $0x1f4] ss:$8 sps:$4 sm:$0xff]   ;;  %v1568_v37 = vld [vmem:[%s2223_s2 + $0x1f0] ss:$8 sps:$4 sm:$0xff]   ;;  %v1576_v40 = vld [vmem:[%s2223_s2 + $0x1e4] ss:$8 sps:$4 sm:$0xff]  }
  0x55   :  { %v1579_v44 = vld [vmem:[%s2223_s2 + $0xd4] ss:$8 sps:$4 sm:$0xff]  }
  0x56   :  { %718 = vmatpush2.bf16.msra.mxu0 %v1431_v46  ;;  %761 = vmatpush2.bf16.msra.mxu1 %v1433_v47  ;;  %v1582_v45 = vld [vmem:[%s2223_s2 + $0x1d4] ss:$8 sps:$4 sm:$0xff]   ;;  %v1577_v46 = vld [vmem:[%s2223_s2 + $0xd0] ss:$8 sps:$4 sm:$0xff]  }
  0x57   :  { %719 = vmatprep.subr.bf16.mxu0 %v1424_v48  ;;  %762 = vmatprep.subr.bf16.mxu1 %v1426_v49  ;;  %v1580_v47 = vld [vmem:[%s2223_s2 + $0x1d0] ss:$8 sps:$4 sm:$0xff]   ;;  %v1585_v48 = vld [vmem:[%s2223_s2 + $0xc4] ss:$8 sps:$4 sm:$0xff]   ;;  %v1591_v52 = vld [vmem:[%s2223_s2 + $0xb4] ss:$8 sps:$4 sm:$0xff]  }
  0x58   :  { %v1588_v49 = vld [vmem:[%s2223_s2 + $0x1c4] ss:$8 sps:$4 sm:$0xff]   ;;  %v1594_v53 = vld [vmem:[%s2223_s2 + $0x1b4] ss:$8 sps:$4 sm:$0xff]  }
  0x59   :  { %v1603_v60 = vld [vmem:[%s2223_s2 + $0x94] ss:$8 sps:$4 sm:$0xff]  }
  0x5a   :  { %720 = vmatpush2.bf16.msra.mxu0 %v1423_v54  ;;  %763 = vmatpush2.bf16.msra.mxu1 %v1425_v55  ;;  %v1589_v54 = vld [vmem:[%s2223_s2 + $0xb0] ss:$8 sps:$4 sm:$0xff]   ;;  %v1606_v61 = vld [vmem:[%s2223_s2 + $0x194] ss:$8 sps:$4 sm:$0xff]  }
  0x5b   :  { %721 = vmatprep.subr.bf16.mxu0 %v1416_v56  ;;  %764 = vmatprep.subr.bf16.mxu1 %v1418_v57  ;;  %v1592_v55 = vld [vmem:[%s2223_s2 + $0x1b0] ss:$8 sps:$4 sm:$0xff]   ;;  %v1597_v56 = vld [vmem:[%s2223_s2 + $0xa4] ss:$8 sps:$4 sm:$0xff]  }
  0x5c   :  { %v1600_v57 = vld [vmem:[%s2223_s2 + $0x1a4] ss:$8 sps:$4 sm:$0xff]  }
  0x5e   :  { %722 = vmatpush2.bf16.msra.mxu0 %v1415_v62  ;;  %765 = vmatpush2.bf16.msra.mxu1 %v1417_v63  ;;  %v1601_v62 = vld [vmem:[%s2223_s2 + $0x90] ss:$8 sps:$4 sm:$0xff]  }
  0x5f   :  { %723 = vmatprep.subr.bf16.mxu0 %v1408_v0  ;;  %766 = vmatprep.subr.bf16.mxu1 %v1410_v1  ;;  %v1604_v63 = vld [vmem:[%s2223_s2 + $0x190] ss:$8 sps:$4 sm:$0xff]   ;;  %v1609_v0 = vld [vmem:[%s2223_s2 + $0x84] ss:$8 sps:$4 sm:$0xff]  }
  0x60   :  { %v1612_v1 = vld [vmem:[%s2223_s2 + $0x184] ss:$8 sps:$4 sm:$0xff]  }
  0x62   :  { %724 = vmatpush2.bf16.msra.mxu0 %v1407_v2  ;;  %767 = vmatpush2.bf16.msra.mxu1 %v1409_v43  ;;  %v1607_v2 = vld [vmem:[%s2223_s2 + $0x80] ss:$8 sps:$4 sm:$0xff]  }
  0x63   :  { %1231 = vmatprep.subr.bf16.mxu0 %v1519_v4  ;;  %1274 = vmatprep.subr.bf16.mxu1 %v1522_v6  ;;  %v1610_v43 = vld [vmem:[%s2223_s2 + $0x180] ss:$8 sps:$4 sm:$0xff]  }
  0x65   :  { %726 = vmatmul.mubr.bf16.vlgmr.msra.gmra.mxu0 %v1864_v39  ;;  %769 = vmatmul.mubr.bf16.vlgmr.msra.gmra.mxu1 %v1864_v39  ;;  %v1525_v39 = vld [vmem:[%s2223_s2 + $0x64] ss:$8 sps:$4 sm:$0xff]   ;;  %s1667_s2 = smov [#allocation2]  }
  0x66   :  { %1232 = vmatpush1.bf16.msra.mxu0 %v1517_v3  ;;  %1275 = vmatpush1.bf16.msra.mxu1 %v1520_v5  ;;  %s1326_s26 = sshll.u32 %s1667_s2, 4  ;;  %s1327_s26 = int_to_ptr.vmem [resolvable:$true] %s1326_s26 }
  0x67   :  { %1233 = vmatprep.subr.bf16.mxu0 %v1525_v39  ;;  %1276 = vmatprep.subr.bf16.mxu1 %v1528_v7  ;;  %s1645_s27 = scalar_lea.vmem %s1327_s26, 512  ;;  %p1650_p1 = scmp.lt.s32.totalorder %s1327_s26, %s1327_s26 }
  0x68   :  { %p1646_p0 = scmp.ne.s32.totalorder %s1327_s26, %s1645_s27  ;;  %p1651_p2 = scmp.lt.s32.totalorder %s1645_s27, %s1645_s27 }
  0x6a   :  { %1234 = vmatpush1.bf16.msra.mxu0 %v1523_v8  ;;  %1277 = vmatpush1.bf16.msra.mxu1 %v1526_v9  ;;  %p1652_p3 = por %p1651_p2, %p1650_p1 }
  0x6b   :  { %1235 = vmatprep.subr.bf16.mxu0 %v1531_v10  ;;  %1278 = vmatprep.subr.bf16.mxu1 %v1534_v11 }
  0x6c   :  { %p1653_p4 = pnand %p1652_p3, %p1646_p0 }
  0x6e   :  { %1236 = vmatpush1.bf16.msra.mxu0 %v1529_v12  ;;  %1279 = vmatpush1.bf16.msra.mxu1 %v1532_v13 }
  0x6f   :  { %1237 = vmatprep.subr.bf16.mxu0 %v1537_v14  ;;  %1280 = vmatprep.subr.bf16.mxu1 %v1540_v15 }
  0x72   :  { %1238 = vmatpush1.bf16.msra.mxu0 %v1535_v16  ;;  %1281 = vmatpush1.bf16.msra.mxu1 %v1538_v17 }
  0x73   :  { %1239 = vmatprep.subr.bf16.mxu0 %v1543_v18  ;;  %1282 = vmatprep.subr.bf16.mxu1 %v1546_v19 }
  0x76   :  { %1240 = vmatpush1.bf16.msra.mxu0 %v1541_v20  ;;  %1283 = vmatpush1.bf16.msra.mxu1 %v1544_v21 }
  0x77   :  { %1241 = vmatprep.subr.bf16.mxu0 %v1549_v22  ;;  %1284 = vmatprep.subr.bf16.mxu1 %v1552_v23 }
  0x7a   :  { %1242 = vmatpush1.bf16.msra.mxu0 %v1547_v24  ;;  %1285 = vmatpush1.bf16.msra.mxu1 %v1550_v25 }
  0x7b   :  { %1243 = vmatprep.subr.bf16.mxu0 %v1555_v26  ;;  %1286 = vmatprep.subr.bf16.mxu1 %v1558_v27 }
  0x7e   :  { %1244 = vmatpush1.bf16.msra.mxu0 %v1553_v28  ;;  %1287 = vmatpush1.bf16.msra.mxu1 %v1556_v29 }
  0x7f   :  { %1245 = vmatprep.subr.bf16.mxu0 %v1561_v30  ;;  %1288 = vmatprep.subr.bf16.mxu1 %v1564_v31 }
  0x82   :  { %1246 = vmatpush1.bf16.msra.mxu0 %v1559_v32  ;;  %1289 = vmatpush1.bf16.msra.mxu1 %v1562_v33 }
  0x83   :  { %1247 = vmatprep.subr.bf16.mxu0 %v1567_v34  ;;  %1290 = vmatprep.subr.bf16.mxu1 %v1570_v35 }
  0x86   :  { %1248 = vmatpush2.bf16.msra.mxu0 %v1565_v36  ;;  %1291 = vmatpush2.bf16.msra.mxu1 %v1568_v37 }
  0x87   :  { %1249 = vmatprep.subr.bf16.mxu0 %v1573_v38  ;;  %1292 = vmatprep.subr.bf16.mxu1 %v1576_v40 }
  0x8a   :  { %1250 = vmatpush2.bf16.msra.mxu0 %v1571_v41  ;;  %1293 = vmatpush2.bf16.msra.mxu1 %v1574_v42 }
  0x8b   :  { %1251 = vmatprep.subr.bf16.mxu0 %v1579_v44  ;;  %1294 = vmatprep.subr.bf16.mxu1 %v1582_v45 }
  0x8e   :  { %1252 = vmatpush2.bf16.msra.mxu0 %v1577_v46  ;;  %1295 = vmatpush2.bf16.msra.mxu1 %v1580_v47 }
  0x8f   :  { %1253 = vmatprep.subr.bf16.mxu0 %v1585_v48  ;;  %1296 = vmatprep.subr.bf16.mxu1 %v1588_v49 }
  0x92   :  { %1254 = vmatpush2.bf16.msra.mxu0 %v1583_v50  ;;  %1297 = vmatpush2.bf16.msra.mxu1 %v1586_v51 }
  0x93   :  { %1255 = vmatprep.subr.bf16.mxu0 %v1591_v52  ;;  %1298 = vmatprep.subr.bf16.mxu1 %v1594_v53 }
  0x96   :  { %1256 = vmatpush2.bf16.msra.mxu0 %v1589_v54  ;;  %1299 = vmatpush2.bf16.msra.mxu1 %v1592_v55 }
  0x97   :  { %1257 = vmatprep.subr.bf16.mxu0 %v1597_v56  ;;  %1300 = vmatprep.subr.bf16.mxu1 %v1600_v57 }
  0x9a   :  { %1258 = vmatpush2.bf16.msra.mxu0 %v1595_v58  ;;  %1301 = vmatpush2.bf16.msra.mxu1 %v1598_v59 }
  0x9b   :  { %1259 = vmatprep.subr.bf16.mxu0 %v1603_v60  ;;  %1302 = vmatprep.subr.bf16.mxu1 %v1606_v61 }
  0x9e   :  { %1260 = vmatpush2.bf16.msra.mxu0 %v1601_v62  ;;  %1303 = vmatpush2.bf16.msra.mxu1 %v1604_v63 }
  0x9f   :  { %1261 = vmatprep.subr.bf16.mxu0 %v1609_v0  ;;  %1304 = vmatprep.subr.bf16.mxu1 %v1612_v1 }
  0xa2   :  { %1262 = vmatpush2.bf16.msra.mxu0 %v1607_v2  ;;  %1305 = vmatpush2.bf16.msra.mxu1 %v1610_v43 }
  0xf5   :  { %v2192_v3 = vpop.f32.mrf.mxu0  ;;  %v2194_v4 = vpop.f32.mrf.mxu1 }
  0xf7   :  { %v2196_v5 = vpop.f32.mrf.mxu0  ;;  %v2198_v6 = vpop.f32.mrf.mxu1 }
  0xf9   :  { %v2200_v39 = vpop.f32.mrf.mxu0  ;;  %v2202_v7 = vpop.f32.mrf.mxu1 }
  0xfb   :  { %v2204_v8 = vpop.f32.mrf.mxu0  ;;  %v2206_v9 = vpop.f32.mrf.mxu1 }
 0x125   :  { %v727_v10 = vpop.f32.mrf.mxu0  ;;  %v770_v12 = vpop.f32.mrf.mxu1 }
 0x126   :  { %v1439_v11 = vmul.f32 -1.442695, %v727_v10  ;;  %v1441_v13 = vmul.f32 -1.442695, %v770_v12 }
 0x127   :  { %v729_v14 = vpop.f32.mrf.mxu0  ;;  %v772_v16 = vpop.f32.mrf.mxu1 }
 0x128   :  { %1613 = vpow2.f32 %v1439_v11  ;;  %v1440_v15 = vmul.f32 -1.442695, %v729_v14  ;;  %v1442_v17 = vmul.f32 -1.442695, %v772_v16 }
 0x129   :  { %1615 = vpow2.f32 %v1441_v13  ;;  %v731_v18 = vpop.f32.mrf.mxu0  ;;  %v774_v20 = vpop.f32.mrf.mxu1 }
 0x12a   :  { %1617 = vpow2.f32 %v1440_v15  ;;  %v1443_v19 = vmul.f32 -1.442695, %v731_v18  ;;  %v1445_v21 = vmul.f32 -1.442695, %v774_v20 }
 0x12b   :  { %1619 = vpow2.f32 %v1442_v17  ;;  %v733_v22 = vpop.f32.mrf.mxu0  ;;  %v776_v24 = vpop.f32.mrf.mxu1 }
 0x12c   :  { %1621 = vpow2.f32 %v1443_v19  ;;  %v1444_v23 = vmul.f32 -1.442695, %v733_v22  ;;  %v1446_v25 = vmul.f32 -1.442695, %v776_v24 }
 0x12d   :  { %1623 = vpow2.f32 %v1445_v21 }
 0x12e   :  { %1625 = vpow2.f32 %v1444_v23 }
 0x12f   :  { %1627 = vpow2.f32 %v1446_v25 }
 0x135   :  { %v1614_v26 = vpop.eup %1613 }
 0x136   :  { %v1616_v27 = vpop.eup %1615  ;;  %v803_v28 = vadd.f32 1.0, %v1614_v26 }
 0x137   :  { %v1618_v29 = vpop.eup %1617  ;;  %v805_v30 = vadd.f32 1.0, %v1616_v27 }
 0x138   :  { %v1620_v31 = vpop.eup %1619  ;;  %1629 = vrcp.f32 %v803_v28  ;;  %v804_v32 = vadd.f32 1.0, %v1618_v29 }
 0x139   :  { %v1622_v33 = vpop.eup %1621  ;;  %1631 = vrcp.f32 %v805_v30  ;;  %v806_v34 = vadd.f32 1.0, %v1620_v31 }
 0x13a   :  { %v1624_v35 = vpop.eup %1623  ;;  %1633 = vrcp.f32 %v804_v32  ;;  %v807_v36 = vadd.f32 1.0, %v1622_v33 }
 0x13b   :  { %v1626_v37 = vpop.eup %1625  ;;  %1635 = vrcp.f32 %v806_v34  ;;  %v809_v38 = vadd.f32 1.0, %v1624_v35 }
 0x13c   :  { %v1628_v40 = vpop.eup %1627  ;;  %1637 = vrcp.f32 %v807_v36  ;;  %v808_v41 = vadd.f32 1.0, %v1626_v37 }
 0x13d   :  { %1639 = vrcp.f32 %v809_v38  ;;  %v810_v42 = vadd.f32 1.0, %v1628_v40 }
 0x13e   :  { %1641 = vrcp.f32 %v808_v41 }
 0x13f   :  { %1643 = vrcp.f32 %v810_v42 }
 0x145   :  { %v1630_v44 = vpop.eup %1629 }
 0x146   :  { %v1632_v45 = vpop.eup %1631  ;;  %v827_v53 = vmul.f32 %v1630_v44, %v727_v10 }
 0x147   :  { %v1634_v46 = vpop.eup %1633  ;;  %v829_v57 = vmul.f32 %v1632_v45, %v770_v12 }
 0x148   :  { %v1636_v47 = vpop.eup %1635  ;;  %v828_v50 = vmul.f32 %v1634_v46, %v729_v14  ;;  %v835_v0 = vmul.f32 %v827_v53, %v2192_v3 }
 0x149   :  { %v1638_v48 = vpop.eup %1637  ;;  %v830_v54 = vmul.f32 %v1636_v47, %v772_v16  ;;  %v837_v43 = vmul.f32 %v829_v57, %v2194_v4 }
 0x14a   :  { %v1640_v49 = vpop.eup %1639  ;;  %v831_v51 = vmul.f32 %v1638_v48, %v731_v18  ;;  %v836_v61 = vmul.f32 %v828_v50, %v2196_v5 }
 0x14b   :  { %v1642_v52 = vpop.eup %1641  ;;  %v833_v55 = vmul.f32 %v1640_v49, %v774_v20  ;;  %v838_v1 = vmul.f32 %v830_v54, %v2198_v6 }
 0x14c   :  { %v1644_v56 = vpop.eup %1643  ;;  %v832_v58 = vmul.f32 %v1642_v52, %v733_v22  ;;  %v839_v59 = vmul.f32 %v831_v51, %v2200_v39 }
 0x14d   :  { %v834_v60 = vmul.f32 %v1644_v56, %v776_v24  ;;  %v841_v62 = vmul.f32 %v833_v55, %v2202_v7 }
 0x14e   :  { %v840_v63 = vmul.f32 %v832_v58, %v2204_v8  ;;  %v843_v11 = vpack.c.bf16 %v839_v59, %v835_v0 }
 0x14f   :  { %v842_v2 = vmul.f32 %v834_v60, %v2206_v9  ;;  %v845_v13 = vpack.c.bf16 %v841_v62, %v837_v43 }
 0x150   :  { %v844_v10 = vpack.c.bf16 %v840_v63, %v836_v61 }
 0x151   :  { %v846_v12 = vpack.c.bf16 %v842_v2, %v838_v1 }
 0x152   :  { %1263 = vmatprep.mubr.bf16.mxu0 %v844_v10 }
 0x153   :  { %1306 = vmatprep.mubr.bf16.mxu1 %v846_v12  ;;  %1264 = vmatmul.mubr.bf16.vlgmr.msra.gmra.mxu0 %v843_v11 }
 0x154   :  { %1307 = vmatmul.mubr.bf16.vlgmr.msra.gmra.mxu1 %v845_v13 }
 0x213   :  { %v1265_v5 = vpop.f32.mrf.mxu0 }
 0x214   :  { %v1308_v39 = vpop.f32.mrf.mxu1 }
 0x215   :  { %v1309_v7 = vadd.f32 %v1308_v39, %v1265_v5  ;;  %v1267_v8 = vpop.f32.mrf.mxu0 }
 0x216   :  { %v1310_v14 = vpop.f32.mrf.mxu1 }
 0x217   :  { %1317 = vst [vmem:[#allocation2] sm:$0xff] %v1309_v7  ;;  %v1311_v3 = vadd.f32 %v1310_v14, %v1267_v8  ;;  %v1269_v6 = vpop.f32.mrf.mxu0 }
 0x218   :  { %v1312_v9 = vpop.f32.mrf.mxu1 }
 0x219   :  { %1318 = vst.msk [vmem:[#allocation2 + $0x8] sm:$0xff] %vm603_vm0, %v1311_v3  ;;  %v1313_v4 = vadd.f32 %v1312_v9, %v1269_v6  ;;  %v1271_v15 = vpop.f32.mrf.mxu0 }
 0x21a   :  { %v1314_v16 = vpop.f32.mrf.mxu1 }
 0x21b   :  { %1319 = vst [vmem:[#allocation2 + $0x10] sm:$0xff] %v1313_v4  ;;  %v1315_v17 = vadd.f32 %v1314_v16, %v1271_v15 }
 0x21d   :  { %1320 = vst.msk [vmem:[#allocation2 + $0x18] sm:$0xff] %vm603_vm0, %v1315_v17 }
 0x21e   :  { %1656 = shalt.err (!%p1653_p4)
}
 0x21f   :  { %s1668_s28 = smov 256   ;;  %s1669_s29 = smov 16  }
 0x220   :  { %1332 = dma.vmem_to_hbm [thread:$0]  %s1327_s26, 512, %s2224_s3, [#allocation3], %s1668_s28, %s1668_s28, %s1669_s29  }
 0x221   :  { %1665 = dma.done.wait [#allocation3], 512  }
 0x222   :  { %1666 = vsyncadd [#allocation3], 4294966784 }
 0x223   :  { %1336 = vsyncpa [#allocation3], 1 }

</bundles_post_ra>
